<compile_context>
chip_gen: v5e
topology: v5e:2x2
jax: 0.10.0
libtpu: 0.0.40
codegen_flags: <defaults>
</compile_context>

<pallas_src>
import jax
import jax.numpy as jnp
from jax.experimental import pallas as pl
from jax.experimental.pallas import tpu as pltpu

INPUT_SIZE = 32
HIDDEN_SIZE = 64
OUTPUT_SIZE = 32

PACK = 4                          # batch samples packed per 128-lane row (4 * 32 = 128)
LANES = PACK * INPUT_SIZE         # 128 (also PACK * OUTPUT_SIZE)
HID_LANES = PACK * HIDDEN_SIZE    # 256
GRAN = PACK * 8                   # 32: batch granularity (4 samples/row * 8 sublanes)


def _round_up(x: int, m: int) -> int:
    return ((x + m - 1) // m) * m


def hearts_nn_kernel(x_ref, w1_ref, b1_ref, w2_ref, b2_ref, o_ref):
    # x_ref  : [R, 128]   4 batch samples per row, 32 features each (lane-dense)
    # w1_ref : [128, 256] 4-way block-diagonal W1^T
    # b1_ref : [1, 256]   4x-tiled bias (f32)
    # w2_ref : [256, 128] 4-way block-diagonal W2^T
    # b2_ref : [1, 128]   4x-tiled bias (f32)
    # o_ref  : [R, 128]   4 output samples per row, 32 features each
    h = jnp.dot(x_ref[...], w1_ref[...], preferred_element_type=jnp.float32)
    h = jnp.maximum(h + b1_ref[...], 0.0)
    # Cast back to the compute dtype so the second matmul stays on the native
    # bf16 MXU path when bf16 operands are used (no-op for f32).
    h = h.astype(w2_ref.dtype)
    out = jnp.dot(h, w2_ref[...], preferred_element_type=jnp.float32)
    o_ref[...] = (out + b2_ref[...]).astype(o_ref.dtype)


def hearts_nn_forward(x, w1, b1, w2, b2, *, block_b=16384, compute_dtype=None):
    """Forward pass of HeartsNN.

    x  : [B, INPUT_SIZE]            (batch-major, like PyTorch)
    w1 : [HIDDEN_SIZE, INPUT_SIZE]  (PyTorch nn.Linear weight layout)
    b1 : [HIDDEN_SIZE]
    w2 : [OUTPUT_SIZE, HIDDEN_SIZE]
    b2 : [OUTPUT_SIZE]
    returns [B, OUTPUT_SIZE] in x.dtype (accumulation / epilogue in f32).
    """
    B = x.shape[0]
    out_dtype = x.dtype
    if compute_dtype is None:
        compute_dtype = x.dtype

    # ---- batch tiling: packed rows of 4 samples, 8-sublane granularity -------
    Bp_min = _round_up(max(B, 1), GRAN)
    n_tiles = max(1, pl.cdiv(Bp_min, _round_up(int(block_b), GRAN)))
    if n_tiles == 1 and Bp_min >= 8192:
        n_tiles = 2            # keep both v7x TensorCores busy on medium batches
    tb = _round_up(pl.cdiv(Bp_min, n_tiles), GRAN)   # batch elements per grid step
    Bp = tb * n_tiles                                # padded batch (minimal padding)
    rows_tile = tb // PACK                            # sublane rows per grid step
    rows_total = Bp // PACK

    # ---- weight / bias prep (tiny, once per call) ----------------------------
    eye = jnp.eye(PACK, dtype=jnp.float32)
    w1_bd = jnp.kron(eye, w1.T.astype(jnp.float32)).astype(compute_dtype)   # [128, 256]
    w2_bd = jnp.kron(eye, w2.T.astype(jnp.float32)).astype(compute_dtype)   # [256, 128]
    b1_t = jnp.tile(b1.astype(jnp.float32), PACK).reshape(1, HID_LANES)     # [1, 256]
    b2_t = jnp.tile(b2.astype(jnp.float32), PACK).reshape(1, LANES)         # [1, 128]

    # ---- activation layout: contiguous [B,32] -> [Bp/4, 128] (no transpose) --
    if Bp != B:
        x = jnp.pad(x, ((0, Bp - B), (0, 0)))       # only the tail rows are padding
    x_packed = x.astype(compute_dtype).reshape(rows_total, LANES)

    cost = pl.CostEstimate(
        flops=2 * Bp * (INPUT_SIZE * HIDDEN_SIZE + HIDDEN_SIZE * OUTPUT_SIZE),
        transcendentals=0,
        bytes_accessed=(
            Bp * INPUT_SIZE * x_packed.dtype.itemsize
            + Bp * OUTPUT_SIZE * jnp.dtype(out_dtype).itemsize
            + w1_bd.size * w1_bd.dtype.itemsize
            + w2_bd.size * w2_bd.dtype.itemsize
            + (b1_t.size + b2_t.size) * 4
        ),
    )

    out_packed = pl.pallas_call(
        hearts_nn_kernel,
        out_shape=jax.ShapeDtypeStruct((rows_total, LANES), out_dtype),
        grid=(n_tiles,),
        in_specs=[
            pl.BlockSpec((rows_tile, LANES), lambda i: (i, 0)),        # activations (pipelined)
            pl.BlockSpec((LANES, HID_LANES), lambda i: (0, 0)),        # weights stay VMEM-resident
            pl.BlockSpec((1, HID_LANES), lambda i: (0, 0)),
            pl.BlockSpec((HID_LANES, LANES), lambda i: (0, 0)),
            pl.BlockSpec((1, LANES), lambda i: (0, 0)),
        ],
        out_specs=pl.BlockSpec((rows_tile, LANES), lambda i: (i, 0)),  # lane-dense stores
        compiler_params=pltpu.CompilerParams(
            dimension_semantics=("parallel",),        # megacore sharding on v7x
            vmem_limit_bytes=32 * 1024 * 1024,        # safe on v5e/v6e/v7x at default tile
        ),
        cost_estimate=cost,
    )(x_packed, w1_bd, b1_t, w2_bd, b2_t)

    out = out_packed.reshape(Bp, OUTPUT_SIZE)
    return out[:B] if Bp != B else out


def init_params(key):
    """Deterministic init mimicking nn.Linear's uniform(-1/sqrt(fan_in), 1/sqrt(fan_in)).
    Weights stay in PyTorch's native [out_features, in_features] layout."""
    k1, k2, k3, k4 = jax.random.split(key, 4)
    bound1 = 1.0 / jnp.sqrt(jnp.float32(INPUT_SIZE))
    bound2 = 1.0 / jnp.sqrt(jnp.float32(HIDDEN_SIZE))
    w1 = jax.random.uniform(k1, (HIDDEN_SIZE, INPUT_SIZE), jnp.float32, -bound1, bound1)
    b1 = jax.random.uniform(k2, (HIDDEN_SIZE,), jnp.float32, -bound1, bound1)
    w2 = jax.random.uniform(k3, (OUTPUT_SIZE, HIDDEN_SIZE), jnp.float32, -bound2, bound2)
    b2 = jax.random.uniform(k4, (OUTPUT_SIZE,), jnp.float32, -bound2, bound2)
    return w1, b1, w2, b2


def reference_forward(x, w1, b1, w2, b2):
    h = jnp.maximum(x @ w1.T + b1, 0.0)
    return h @ w2.T + b2


if __name__ == "__main__":
    key = jax.random.PRNGKey(0)
    kx, kp, kx2 = jax.random.split(key, 3)
    w1, b1, w2, b2 = init_params(kp)

    # 1) Small batch matching the module spec (f32).
    batch = 8
    x = jax.random.normal(kx, (batch, INPUT_SIZE), jnp.float32)
    out = jax.block_until_ready(hearts_nn_forward(x, w1, b1, w2, b2))
    ref = reference_forward(x, w1, b1, w2, b2)
    assert out.shape == (batch, OUTPUT_SIZE)
    assert jnp.allclose(out, ref, atol=1e-4, rtol=1e-4)

    # 2) Ragged batch spanning several grid tiles (exercises padding + pipeline).
    batch2 = 300
    x2 = jax.random.normal(kx2, (batch2, INPUT_SIZE), jnp.float32)
    out2 = jax.block_until_ready(hearts_nn_forward(x2, w1, b1, w2, b2, block_b=128))
    ref2 = reference_forward(x2, w1, b1, w2, b2)
    assert out2.shape == (batch2, OUTPUT_SIZE)
    assert jnp.allclose(out2, ref2, atol=1e-4, rtol=1e-4)

    # 3) bf16 compute path (halved activation HBM traffic, native bf16 MXU).
    out_bf16 = jax.block_until_ready(
        hearts_nn_forward(x2, w1, b1, w2, b2, block_b=128, compute_dtype=jnp.bfloat16))
    assert jnp.allclose(out_bf16, ref2, atol=3e-2, rtol=3e-2)

    print("KERNEL_OK")
</pallas_src>

<mosaic_0001>
module attributes {stable_mosaic.version = 11 : i64} {
  func.func @hearts_nn_kernel(%arg0: i32, %arg1: memref<8x128xf32, #tpu.memory_space<vmem>>, %arg2: memref<128x256xf32, #tpu.memory_space<vmem>>, %arg3: memref<1x256xf32, #tpu.memory_space<vmem>>, %arg4: memref<256x128xf32, #tpu.memory_space<vmem>>, %arg5: memref<1x128xf32, #tpu.memory_space<vmem>>, %arg6: memref<8x128xf32, #tpu.memory_space<vmem>>) attributes {dimension_semantics = [#tpu.dimension_semantics<parallel>], iteration_bounds = array<i64: 1>, scalar_prefetch = 0 : i64, scratch_operands = 0 : i64, tpu.core_type = #tpu.core_type<tc>, window_params = [{transform_indices = @transform_0, window_bounds = array<i64: 8, 128>}, {pipeline_mode = #tpu.pipeline_mode<synchronous>, transform_indices = @transform_1, window_bounds = array<i64: 128, 256>}, {pipeline_mode = #tpu.pipeline_mode<synchronous>, transform_indices = @transform_2, window_bounds = array<i64: 1, 256>}, {pipeline_mode = #tpu.pipeline_mode<synchronous>, transform_indices = @transform_3, window_bounds = array<i64: 256, 128>}, {pipeline_mode = #tpu.pipeline_mode<synchronous>, transform_indices = @transform_4, window_bounds = array<i64: 1, 128>}, {transform_indices = @transform_5, window_bounds = array<i64: 8, 128>}]} {
    %c0 = arith.constant 0 : index
    %c0_0 = arith.constant 0 : index
    %0 = vector.load %arg1[%c0, %c0_0] : memref<8x128xf32, #tpu.memory_space<vmem>>, vector<8x128xf32>
    %c0_1 = arith.constant 0 : index
    %c0_2 = arith.constant 0 : index
    %1 = vector.load %arg2[%c0_1, %c0_2] : memref<128x256xf32, #tpu.memory_space<vmem>>, vector<128x256xf32>
    %cst = arith.constant dense<0.000000e+00> : vector<8x256xf32>
    %2 = tpu.matmul %0, %1, %cst {dimension_numbers = #tpu.dot_dimension_numbers<[1], [0], [0], [1], [0, 0, 1, 1], [], []>} : vector<8x128xf32>, vector<128x256xf32>, vector<8x256xf32> -> vector<8x256xf32>
    %c0_3 = arith.constant 0 : index
    %c0_4 = arith.constant 0 : index
    %3 = vector.load %arg3[%c0_3, %c0_4] : memref<1x256xf32, #tpu.memory_space<vmem>>, vector<1x256xf32>
    %4 = vector.broadcast %3 : vector<1x256xf32> to vector<8x256xf32>
    %5 = arith.addf %2, %4 : vector<8x256xf32>
    %cst_5 = arith.constant 0.000000e+00 : f32
    %6 = vector.broadcast %cst_5 : f32 to vector<8x256xf32>
    %7 = arith.maximumf %5, %6 : vector<8x256xf32>
    %c0_6 = arith.constant 0 : index
    %c0_7 = arith.constant 0 : index
    %8 = vector.load %arg4[%c0_6, %c0_7] : memref<256x128xf32, #tpu.memory_space<vmem>>, vector<256x128xf32>
    %cst_8 = arith.constant dense<0.000000e+00> : vector<8x128xf32>
    %9 = tpu.matmul %7, %8, %cst_8 {dimension_numbers = #tpu.dot_dimension_numbers<[1], [0], [0], [1], [0, 0, 1, 1], [], []>} : vector<8x256xf32>, vector<256x128xf32>, vector<8x128xf32> -> vector<8x128xf32>
    %c0_9 = arith.constant 0 : index
    %c0_10 = arith.constant 0 : index
    %10 = vector.load %arg5[%c0_9, %c0_10] : memref<1x128xf32, #tpu.memory_space<vmem>>, vector<1x128xf32>
    %11 = vector.broadcast %10 : vector<1x128xf32> to vector<8x128xf32>
    %12 = arith.addf %9, %11 : vector<8x128xf32>
    %c0_11 = arith.constant 0 : index
    %c0_12 = arith.constant 0 : index
    %13 = vector.load %arg6[%c0_11, %c0_12] : memref<8x128xf32, #tpu.memory_space<vmem>>, vector<8x128xf32>
    tpu.vector_store %arg6[%c0_11, %c0_12], %12 {strides = array<i32>} : memref<8x128xf32, #tpu.memory_space<vmem>>, vector<8x128xf32>,
    return
  }
  func.func @transform_0(%arg0: i32) -> (i32, i32) {
    %c0_i32 = arith.constant 0 : i32
    %c0_i32_0 = arith.constant 0 : i32
    return %arg0, %c0_i32 : i32, i32
  }
  func.func @transform_1(%arg0: i32) -> (i32, i32) {
    %c0_i32 = arith.constant 0 : i32
    %c0_i32_0 = arith.constant 0 : i32
    %c0_i32_1 = arith.constant 0 : i32
    return %c0_i32, %c0_i32_0 : i32, i32
  }
  func.func @transform_2(%arg0: i32) -> (i32, i32) {
    %c0_i32 = arith.constant 0 : i32
    %c0_i32_0 = arith.constant 0 : i32
    %c0_i32_1 = arith.constant 0 : i32
    return %c0_i32, %c0_i32_0 : i32, i32
  }
  func.func @transform_3(%arg0: i32) -> (i32, i32) {
    %c0_i32 = arith.constant 0 : i32
    %c0_i32_0 = arith.constant 0 : i32
    %c0_i32_1 = arith.constant 0 : i32
    return %c0_i32, %c0_i32_0 : i32, i32
  }
  func.func @transform_4(%arg0: i32) -> (i32, i32) {
    %c0_i32 = arith.constant 0 : i32
    %c0_i32_0 = arith.constant 0 : i32
    %c0_i32_1 = arith.constant 0 : i32
    return %c0_i32, %c0_i32_0 : i32, i32
  }
  func.func @transform_5(%arg0: i32) -> (i32, i32) {
    %c0_i32 = arith.constant 0 : i32
    %c0_i32_0 = arith.constant 0 : i32
    return %arg0, %c0_i32 : i32, i32
  }
}

</mosaic_0001>

<bundles_post_ra>
// kernel: tpu_custom_call.1
= control target key start
LH: loop header
LB: loop body
LE: loop exit
PB: predicated region body
PF: predicated region fallthrough
CT: control target
= control target key end

     0   :  { %10 = vsyncpa [#allocation3], 0  ;;  %s452_s0 = inlined_call_operand.hbm [shape: f32[8,128], index: 0, kind: input, shape index: {}]   ;;  %s453_s1 = inlined_call_operand.hbm [shape: f32[128,256], index: 1, kind: input, shape index: {}]   ;;  %s454_s2 = inlined_call_operand.hbm [shape: f32[1,256], index: 2, kind: input, shape index: {}]   ;;  %s455_s3 = inlined_call_operand.hbm [shape: f32[256,128], index: 3, kind: input, shape index: {}]   ;;  %s456_s4 = inlined_call_operand.vmem [shape: f32[1,128], index: 4, kind: input, shape index: {}]   ;;  %s457_s5 = inlined_call_operand.hbm [shape: f32[8,128], index: 5, kind: output, shape index: {}]  }
   0x1   :  { %11 = vsyncpa [#allocation6], 0 }
   0x2   :  { %12 = vsyncpa [#allocation9], 0  ;;  %s29_s20 = sshll.u32 %s453_s1, 4  ;;  %s30_s20 = int_to_ptr.hbm [resolvable:$true] %s29_s20 }
   0x3   :  { %13 = vsyncpa [#allocation4], 0  ;;  %s395_s21 = smov [#allocation5]   ;;  %s19_s25 = sshll.u32 %s452_s0, 4  ;;  %s20_s25 = int_to_ptr.hbm [resolvable:$true] %s19_s25 }
   0x4   :  { %s31_s22 = sshll.u32 %s395_s21, 4  ;;  %s396_s26 = smov 256   ;;  %s32_s22 = int_to_ptr.vmem [resolvable:$true] %s31_s22 }
   0x5   :  { %s397_s27 = smov 16   ;;  %s398_s28 = smov [#allocation2]  }
   0x6   :  { %37 = dma.hbm_to_vmem [thread:$0]  %s30_s20, 4096, %s32_s22, [#allocation6], %s396_s26, %s396_s26, %s397_s27  }
   0x7   :  { %s21_s29 = sshll.u32 %s398_s28, 4  ;;  %s43_s7 = sshll.u32 %s454_s2, 4  ;;  %s22_s29 = int_to_ptr.vmem [resolvable:$true] %s21_s29  ;;  %s44_s7 = int_to_ptr.hbm [resolvable:$true] %s43_s7 }
   0x8   :  { %24 = dma.hbm_to_vmem [thread:$0]  %s20_s25, 128, %s22_s29, [#allocation3]  }
   0x9   :  { %s53_s9 = sshll.u32 %s455_s3, 4  ;;  %s399_s10 = smov [#allocation7]   ;;  %s54_s9 = int_to_ptr.hbm [resolvable:$true] %s53_s9 }
   0xa   :  { %s45_s11 = sshll.u32 %s399_s10, 4  ;;  %s400_s0 = smov [#allocation8]   ;;  %s46_s11 = int_to_ptr.vmem [resolvable:$true] %s45_s11 }
   0xb   :  { %48 = dma.hbm_to_vmem [thread:$0]  %s44_s7, 32, %s46_s11, [#allocation6]  }
   0xc   :  { %s55_s12 = sshll.u32 %s400_s0, 4  ;;  %s401_s13 = smov 128   ;;  %s56_s12 = int_to_ptr.vmem [resolvable:$true] %s55_s12 }
   0xd   :  { %s402_s14 = smov 8  }
   0xe   :  { %61 = dma.hbm_to_vmem [thread:$0]  %s54_s9, 4096, %s56_s12, [#allocation9], %s401_s13, %s401_s13, %s402_s14  }
   0xf   :  { %387 = dma.done.wait [#allocation3], 128  }
  0x10   :  { %388 = vsyncadd [#allocation3], 4294967168 }
  0x11   :  { %389 = dma.done.wait [#allocation6], 4128  }
  0x12   :  { %390 = vsyncadd [#allocation6], 4294963168 }
  0x13   :  { %391 = dma.done.wait [#allocation9], 4096  }
  0x14   :  { %392 = vsyncadd [#allocation9], 4294963200  ;;  %v111_v0 = vld [vmem:[#allocation5 + $0xf0] sm:$0xff]  ;;  %v109_v1 = vld [vmem:[#allocation5 + $0xe0] sm:$0xff]  ;;  %s403_s15 = smov [#allocation10]   ;;  %s245_s19 = sshll.u32 %s457_s5, 4  ;;  %s246_s19 = int_to_ptr.hbm [resolvable:$true] %s245_s19 }
  0x15   :  { %v112_v2 = vld [vmem:[#allocation5 + $0xf8] sm:$0xff]  ;;  %119 = vmatpush.msra.mxu0 %v111_v0  ;;  %v110_v3 = vld [vmem:[#allocation5 + $0xe8] sm:$0xff]  ;;  %v107_v4 = vld [vmem:[#allocation5 + $0xd0] sm:$0xff]  ;;  %s243_s16 = sshll.u32 %s403_s15, 4  ;;  %s244_s16 = int_to_ptr.vmem [resolvable:$true] %s243_s16 }
  0x16   :  { %139 = vmatpush.msra.mxu1 %v112_v2  ;;  %v108_v5 = vld [vmem:[#allocation5 + $0xd8] sm:$0xff]  ;;  %v105_v6 = vld [vmem:[#allocation5 + $0xc0] sm:$0xff]  ;;  %v106_v7 = vld [vmem:[#allocation5 + $0xc8] sm:$0xff] }
  0x17   :  { %120 = vmatpush.msra.mxu0 %v109_v1  ;;  %v103_v8 = vld [vmem:[#allocation5 + $0xb0] sm:$0xff]  ;;  %v104_v9 = vld [vmem:[#allocation5 + $0xb8] sm:$0xff]  ;;  %v101_v10 = vld [vmem:[#allocation5 + $0xa0] sm:$0xff] }
  0x18   :  { %140 = vmatpush.msra.mxu1 %v110_v3  ;;  %v102_v11 = vld [vmem:[#allocation5 + $0xa8] sm:$0xff]  ;;  %v99_v12 = vld [vmem:[#allocation5 + $0x90] sm:$0xff]  ;;  %v100_v13 = vld [vmem:[#allocation5 + $0x98] sm:$0xff] }
  0x19   :  { %121 = vmatpush.msra.mxu0 %v107_v4  ;;  %v176_v14 = vld [vmem:[#allocation8 + $0x78] sm:$0xff]  ;;  %v175_v15 = vld [vmem:[#allocation8 + $0x70] sm:$0xff]  ;;  %v98_v18 = vld [vmem:[#allocation5 + $0x88] sm:$0xff] }
  0x1a   :  { %141 = vmatpush.msra.mxu1 %v108_v5  ;;  %v192_v16 = vld [vmem:[#allocation8 + $0xf8] sm:$0xff]  ;;  %197 = vmatpush.msra.mxu2 %v176_v14  ;;  %v191_v19 = vld [vmem:[#allocation8 + $0xf0] sm:$0xff]  ;;  %v174_v20 = vld [vmem:[#allocation8 + $0x68] sm:$0xff] }
  0x1b   :  { %122 = vmatpush.msra.mxu0 %v105_v6  ;;  %v97_v17 = vld [vmem:[#allocation5 + $0x80] sm:$0xff]  ;;  %217 = vmatpush.msra.mxu3 %v192_v16  ;;  %v190_v21 = vld [vmem:[#allocation8 + $0xe8] sm:$0xff]  ;;  %v96_v23 = vld [vmem:[#allocation5 + $0x78] sm:$0xff] }
  0x1c   :  { %142 = vmatpush.msra.mxu1 %v106_v7  ;;  %v95_v22 = vld [vmem:[#allocation5 + $0x70] sm:$0xff]  ;;  %198 = vmatpush.msra.mxu2 %v175_v15  ;;  %v173_v24 = vld [vmem:[#allocation8 + $0x60] sm:$0xff]  ;;  %v172_v28 = vld [vmem:[#allocation8 + $0x58] sm:$0xff] }
  0x1d   :  { %123 = vmatpush.msra.mxu0 %v103_v8  ;;  %218 = vmatpush.msra.mxu3 %v191_v19  ;;  %v189_v25 = vld [vmem:[#allocation8 + $0xe0] sm:$0xff]  ;;  %v188_v29 = vld [vmem:[#allocation8 + $0xd8] sm:$0xff]  ;;  %v91_v30 = vld [vmem:[#allocation5 + $0x50] sm:$0xff] }
  0x1e   :  { %143 = vmatpush.msra.mxu1 %v104_v9  ;;  %v93_v26 = vld [vmem:[#allocation5 + $0x60] sm:$0xff]  ;;  %v94_v27 = vld [vmem:[#allocation5 + $0x68] sm:$0xff]  ;;  %199 = vmatpush.msra.mxu2 %v174_v20  ;;  %v92_v31 = vld [vmem:[#allocation5 + $0x58] sm:$0xff] }
  0x1f   :  { %124 = vmatpush.msra.mxu0 %v101_v10  ;;  %219 = vmatpush.msra.mxu3 %v190_v21  ;;  %v171_v32 = vld [vmem:[#allocation8 + $0x50] sm:$0xff]  ;;  %v89_v34 = vld [vmem:[#allocation5 + $0x40] sm:$0xff]  ;;  %v90_v35 = vld [vmem:[#allocation5 + $0x48] sm:$0xff] }
  0x20   :  { %144 = vmatpush.msra.mxu1 %v102_v11  ;;  %200 = vmatpush.msra.mxu2 %v173_v24  ;;  %v187_v33 = vld [vmem:[#allocation8 + $0xd0] sm:$0xff]  ;;  %v170_v36 = vld [vmem:[#allocation8 + $0x48] sm:$0xff]  ;;  %v169_v40 = vld [vmem:[#allocation8 + $0x40] sm:$0xff] }
  0x21   :  { %125 = vmatpush.msra.mxu0 %v99_v12  ;;  %220 = vmatpush.msra.mxu3 %v189_v25  ;;  %v186_v37 = vld [vmem:[#allocation8 + $0xc8] sm:$0xff]  ;;  %v88_v39 = vld [vmem:[#allocation5 + $0x38] sm:$0xff]  ;;  %v185_v41 = vld [vmem:[#allocation8 + $0xc0] sm:$0xff] }
  0x22   :  { %145 = vmatpush.msra.mxu1 %v100_v13  ;;  %201 = vmatpush.msra.mxu2 %v172_v28  ;;  %v87_v38 = vld [vmem:[#allocation5 + $0x30] sm:$0xff]  ;;  %v85_v42 = vld [vmem:[#allocation5 + $0x20] sm:$0xff]  ;;  %v86_v43 = vld [vmem:[#allocation5 + $0x28] sm:$0xff] }
  0x23   :  { %126 = vmatpush.msra.mxu0 %v97_v17  ;;  %221 = vmatpush.msra.mxu3 %v188_v29  ;;  %v168_v44 = vld [vmem:[#allocation8 + $0x38] sm:$0xff]  ;;  %v83_v46 = vld [vmem:[#allocation5 + $0x10] sm:$0xff]  ;;  %v82_v51 = vld [vmem:[#allocation5 + $0x8] sm:$0xff] }
  0x24   :  { %146 = vmatpush.msra.mxu1 %v98_v18  ;;  %202 = vmatpush.msra.mxu2 %v171_v32  ;;  %v184_v45 = vld [vmem:[#allocation8 + $0xb8] sm:$0xff]  ;;  %v167_v48 = vld [vmem:[#allocation8 + $0x30] sm:$0xff]  ;;  %v166_v53 = vld [vmem:[#allocation8 + $0x28] sm:$0xff] }
  0x25   :  { %127 = vmatpush.msra.mxu0 %v95_v22  ;;  %222 = vmatpush.msra.mxu3 %v187_v33  ;;  %v84_v47 = vld [vmem:[#allocation5 + $0x18] sm:$0xff]  ;;  %v81_v50 = vld [vmem:[#allocation5] sm:$0xff]  ;;  %v182_v54 = vld [vmem:[#allocation8 + $0xa8] sm:$0xff] }
  0x26   :  { %147 = vmatpush.msra.mxu1 %v96_v23  ;;  %203 = vmatpush.msra.mxu2 %v170_v36  ;;  %v183_v49 = vld [vmem:[#allocation8 + $0xb0] sm:$0xff]  ;;  %v165_v55 = vld [vmem:[#allocation8 + $0x20] sm:$0xff]  ;;  %v164_v57 = vld [vmem:[#allocation8 + $0x18] sm:$0xff] }
  0x27   :  { %128 = vmatpush.msra.mxu0 %v93_v26  ;;  %223 = vmatpush.msra.mxu3 %v186_v37  ;;  %v80_v52 = vld [vmem:[#allocation2] sm:$0xff]  ;;  %v181_v56 = vld [vmem:[#allocation8 + $0xa0] sm:$0xff]  ;;  %v162_v60 = vld [vmem:[#allocation8 + $0x8] sm:$0xff] }
  0x28   :  { %148 = vmatpush.msra.mxu1 %v94_v27  ;;  %204 = vmatpush.msra.mxu2 %v169_v40  ;;  %v163_v58 = vld [vmem:[#allocation8 + $0x10] sm:$0xff]  ;;  %v180_v59 = vld [vmem:[#allocation8 + $0x98] sm:$0xff]  ;;  %v161_v62 = vld [vmem:[#allocation8] sm:$0xff] }
  0x29   :  { %129 = vmatpush.msra.mxu0 %v91_v30  ;;  %224 = vmatpush.msra.mxu3 %v185_v41  ;;  %v179_v61 = vld [vmem:[#allocation8 + $0x90] sm:$0xff]  ;;  %v178_v63 = vld [vmem:[#allocation8 + $0x88] sm:$0xff]  ;;  %v177_v0 = vld [vmem:[#allocation8 + $0x80] sm:$0xff] }
  0x2a   :  { %149 = vmatpush.msra.mxu1 %v92_v31  ;;  %205 = vmatpush.msra.mxu2 %v168_v44  ;;  %v113_v1 = vld [vmem:[#allocation7] sm:$0x3]  ;;  %v266_v10 = vld [vmem:[%s456_s4] ss:$0 sm:$0xff] }
  0x2b   :  { %130 = vmatpush.msra.mxu0 %v89_v34  ;;  %225 = vmatpush.msra.mxu3 %v184_v45  ;;  %v115_v2 = vperm.slane %v113_v1, 0  ;;  %v116_v3 = vperm.slane %v113_v1, 1 }
  0x2c   :  { %150 = vmatpush.msra.mxu1 %v90_v35  ;;  %206 = vmatpush.msra.mxu2 %v167_v48 }
  0x2d   :  { %131 = vmatpush.msra.mxu0 %v87_v38  ;;  %226 = vmatpush.msra.mxu3 %v183_v49 }
  0x2e   :  { %151 = vmatpush.msra.mxu1 %v88_v39  ;;  %207 = vmatpush.msra.mxu2 %v166_v53 }
  0x2f   :  { %132 = vmatpush.msra.mxu0 %v85_v42  ;;  %227 = vmatpush.msra.mxu3 %v182_v54 }
  0x30   :  { %152 = vmatpush.msra.mxu1 %v86_v43  ;;  %208 = vmatpush.msra.mxu2 %v165_v55 }
  0x31   :  { %133 = vmatpush.msra.mxu0 %v83_v46  ;;  %228 = vmatpush.msra.mxu3 %v181_v56 }
  0x32   :  { %153 = vmatpush.msra.mxu1 %v84_v47  ;;  %209 = vmatpush.msra.mxu2 %v164_v57 }
  0x33   :  { %134 = vmatpush.msra.mxu0 %v81_v50  ;;  %229 = vmatpush.msra.mxu3 %v180_v59 }
  0x34   :  { %154 = vmatpush.msra.mxu1 %v82_v51  ;;  %135 = vmatmul.f32.vlgmr.msra.gmra.mxu0 %v80_v52 }
  0x35   :  { %155 = vmatmul.f32.vlgmr.msra.gmra.mxu1 %v80_v52  ;;  %210 = vmatpush.msra.mxu2 %v163_v58 }
  0x36   :  { %230 = vmatpush.msra.mxu3 %v179_v61 }
  0x37   :  { %211 = vmatpush.msra.mxu2 %v162_v60 }
  0x38   :  { %231 = vmatpush.msra.mxu3 %v178_v63 }
  0x39   :  { %212 = vmatpush.msra.mxu2 %v161_v62 }
  0x3a   :  { %232 = vmatpush.msra.mxu3 %v177_v0 }
  0xb1   :  { %v136_v4 = vpop.f32.mrf.mxu0 }
  0xb2   :  { %v156_v5 = vpop.f32.mrf.mxu1  ;;  %v137_v6 = vadd.f32 %v136_v4, %v115_v2 }
  0xb3   :  { %v157_v7 = vadd.f32 %v156_v5, %v116_v3 }
  0xb4   :  { %v159_v8 = vmax.f32 %v137_v6, 0.0 }
  0xb5   :  { %v160_v9 = vmax.f32 %v157_v7, 0.0 }
  0xb6   :  { %213 = vmatmul.f32.vlgmr.msra.gmra.mxu2 %v159_v8 }
  0xb7   :  { %233 = vmatmul.f32.vlgmr.msra.gmra.mxu3 %v160_v9 }
 0x139   :  { %v214_v11 = vpop.f32.mrf.mxu2 }
 0x13a   :  { %v234_v12 = vpop.f32.mrf.mxu3  ;;  %v215_v13 = vadd.f32 %v266_v10, %v214_v11 }
 0x13c   :  { %v235_v14 = vadd.f32 %v234_v12, %v215_v13 }
 0x13e   :  { %237 = vst [vmem:[#allocation10] sm:$0xff] %v235_v14 }
 0x13f   :  { %248 = dma.vmem_to_hbm [thread:$0]  %s244_s16, 128, %s246_s19, [#allocation4]  }
 0x140   :  { %393 = dma.done.wait [#allocation4], 128  }
 0x141   :  { %394 = vsyncadd [#allocation4], 4294967168 }
 0x142   :  { %253 = vsyncpa [#allocation3], 1 }
 0x143   :  { %254 = vsyncpa [#allocation6], 1 }
 0x144   :  { %255 = vsyncpa [#allocation9], 1 }
 0x145   :  { %256 = vsyncpa [#allocation4], 1 }

</bundles_post_ra>
